<compile_context>
chip_gen: v7x
topology: tpu7x:2x2x1
jax: 0.10.0
libtpu: 0.0.40
codegen_flags: <defaults>
</compile_context>

<pallas_src>
import functools
import math

import jax
import jax.numpy as jnp
import numpy as np
from jax import lax
from jax.experimental import pallas as pl
from jax.experimental.pallas import tpu as pltpu


# ---------------------------------------------------------------------------
# Pallas kernel: one grid step per batch element, all heads fused.
# ---------------------------------------------------------------------------
def _attention_kernel(x_ref, wbig_ref, wout_ref, cos_ref, sin_ref, mask_ref,
                      o_ref, acc_ref, *, heads, dim_head, fill_value):
    H, Dh = heads, dim_head
    HDh = H * Dh

    # x is f32 in HBM; cast to bf16 on the VPU after the (cheaper) f32 load.
    x = x_ref[0].astype(jnp.bfloat16)          # (N, D)
    wbig = wbig_ref[...]                       # (D, 5*HDh) bf16, scale folded in q cols

    # One fused projection: [q*scale | rotate_half(q)*scale | k | rotate_half(k) | v]
    xw = jnp.dot(x, wbig, preferred_element_type=jnp.float32)   # (N, 5*HDh) f32

    cos = cos_ref[...]                         # (N, Dh) f32  (shared by all heads)
    sin = sin_ref[...]                         # (N, Dh) f32

    masked = mask_ref[0] != 0                  # (N, N) bool  (int8 input)

    nt_dims = (((1,), (1,)), ((), ()))         # contract last dims of both (q @ k^T)

    for h in range(H):   # static unroll; heads are few (TODO(synk): fori_loop for large H)
        lo = h * Dh
        hi = lo + Dh
        # Rotary embedding per head: rot(x) = x*cos + rotate_half(x)*sin
        # (rotate_half + softmax scale already folded into the weights).
        q_h = xw[:, 0 * HDh + lo:0 * HDh + hi] * cos + xw[:, 1 * HDh + lo:1 * HDh + hi] * sin
        k_h = xw[:, 2 * HDh + lo:2 * HDh + hi] * cos + xw[:, 3 * HDh + lo:3 * HDh + hi] * sin
        v_h = xw[:, 4 * HDh + lo:4 * HDh + hi]

        dots = lax.dot_general(q_h, k_h, nt_dims,
                               preferred_element_type=jnp.float32)   # (N, N), scale folded
        dots = jnp.where(masked, fill_value, dots)                   # masked_fill(mask, 1e-9)

        # Softmax (max-subtracted, f32); the divide is deferred to after attn@V.
        dots = dots - jnp.max(dots, axis=-1, keepdims=True)
        p = jnp.exp(dots)
        s = jnp.sum(p, axis=-1, keepdims=True)                       # (N, 1)

        o_h = jnp.dot(p.astype(jnp.bfloat16), v_h.astype(jnp.bfloat16),
                      preferred_element_type=jnp.float32)            # (N, Dh)
        # Write into the fixed scratch slice: bounds the per-head live range and
        # replaces the old list + concatenate relayout.
        acc_ref[:, lo:hi] = o_h * pl.reciprocal(s, approx=False)

    # Single output projection: (N, HDh) x (HDh, D), stored once.
    proj = jnp.dot(acc_ref[...].astype(jnp.bfloat16), wout_ref[...],
                   preferred_element_type=jnp.float32)               # (N, D)
    o_ref[...] = proj[None, :, :].astype(o_ref.dtype)


# ---------------------------------------------------------------------------
# Rotary tables + pair-swap matrix (constants; cached per (N, Dh)).
# ---------------------------------------------------------------------------
@functools.lru_cache(maxsize=None)
def _rotary_tables(n, dim_head, rot_dim=32, theta=10000.0):
    inv_freq = 1.0 / (theta ** (np.arange(0, rot_dim, 2, dtype=np.float32) / rot_dim))
    t = np.arange(n, dtype=np.float32)
    freqs = np.repeat(t[:, None] * inv_freq[None, :], 2, axis=-1)       # (N, rot_dim)
    cos = np.concatenate(
        [np.cos(freqs), np.ones((n, dim_head - rot_dim), np.float32)], axis=-1)
    sin = np.concatenate(
        [np.sin(freqs), np.zeros((n, dim_head - rot_dim), np.float32)], axis=-1)
    # Pair-swap matrix: rotate_half(x)[2i] = -x[2i+1], rotate_half(x)[2i+1] = x[2i]
    rot = np.zeros((dim_head, dim_head), np.float32)
    for i in range(rot_dim // 2):
        rot[2 * i + 1, 2 * i] = -1.0
        rot[2 * i, 2 * i + 1] = 1.0
    return cos, sin, rot


# ---------------------------------------------------------------------------
# Plain-JAX glue: weight fusion, rotary + scale folding, pallas_call wrapper.
# ---------------------------------------------------------------------------
def attention_forward(x, mask, w_qkv, w_out, *, heads, dim_head, rot_dim=32):
    """x: (B,N,D) f32; mask: (B,N,N) bool; w_qkv: (3*H*Dh, D); w_out: (D, H*Dh)."""
    B, N, D = x.shape
    H, Dh = heads, dim_head
    HDh = H * Dh
    scale = Dh ** (-0.5)
    fill_value = 1e-9  # float32 path of the PyTorch module

    # to_qkv weight in (in, out) layout, split into q/k/v column blocks.
    W = w_qkv.T                                     # (D, 3*HDh), columns are (h d)
    Wq, Wk, Wv = W[:, :HDh], W[:, HDh:2 * HDh], W[:, 2 * HDh:]

    cos_h, sin_h, rot = _rotary_tables(N, Dh, rot_dim)
    rot = jnp.asarray(rot)                          # (Dh, Dh)

    # Fold the rotary pair-swap into the projection weights (per head).
    def fold_rot(Wp):
        return jnp.einsum('dhk,kj->dhj', Wp.reshape(D, H, Dh), rot).reshape(D, HDh)

    # Softmax scale is folded into BOTH q column blocks (linear and rotate_half),
    # so the kernel never multiplies the (N,N) logits by scale.
    Wbig = jnp.concatenate(
        [Wq * scale, fold_rot(Wq) * scale, Wk, fold_rot(Wk), Wv],
        axis=1).astype(jnp.bfloat16)                # (D, 5*HDh)
    Wout = w_out.T.astype(jnp.bfloat16)             # (HDh, D)

    cos = jnp.asarray(cos_h)                        # (N, Dh) f32 (NOT tiled per head)
    sin = jnp.asarray(sin_h)

    mask_i8 = mask.astype(jnp.int8)

    kernel = functools.partial(_attention_kernel, heads=H, dim_head=Dh,
                               fill_value=fill_value)

    grid_spec = pltpu.PrefetchScalarGridSpec(
        num_scalar_prefetch=0,
        grid=(B,),
        in_specs=[
            pl.BlockSpec((1, N, D), lambda b: (b, 0, 0)),     # x (f32, cast in-kernel)
            pl.BlockSpec((D, 5 * HDh), lambda b: (0, 0)),     # fused qkv+rot weights
            pl.BlockSpec((HDh, D), lambda b: (0, 0)),         # output projection
            pl.BlockSpec((N, Dh), lambda b: (0, 0)),          # cos (per-head shared)
            pl.BlockSpec((N, Dh), lambda b: (0, 0)),          # sin
            pl.BlockSpec((1, N, N), lambda b: (b, 0, 0)),     # mask (int8)
        ],
        out_specs=pl.BlockSpec((1, N, D), lambda b: (b, 0, 0)),
        scratch_shapes=[pltpu.VMEM((N, HDh), jnp.float32)],   # per-head output slab
    )

    return pl.pallas_call(
        kernel,
        out_shape=jax.ShapeDtypeStruct((B, N, D), jnp.float32),
        grid_spec=grid_spec,
        compiler_params=pltpu.CompilerParams(
            dimension_semantics=("parallel",),
            vmem_limit_bytes=48 * 1024 * 1024,   # fits v7x's 64 MiB with headroom
        ),
    )(x, Wbig, Wout, cos, sin, mask_i8)


# ---------------------------------------------------------------------------
# Pure-JAX reference (mirrors the PyTorch forward, full f32) for correctness.
# ---------------------------------------------------------------------------
def attention_reference(x, mask, w_qkv, w_out, *, heads, dim_head, rot_dim=32):
    B, N, D = x.shape
    H, Dh = heads, dim_head
    scale = Dh ** (-0.5)

    qkv = x @ w_qkv.T
    q, k, v = jnp.split(qkv, 3, axis=-1)
    to_heads = lambda t: t.reshape(B, N, H, Dh).transpose(0, 2, 1, 3)
    q, k, v = map(to_heads, (q, k, v))

    inv_freq = 1.0 / (10000.0 ** (jnp.arange(0, rot_dim, 2, dtype=jnp.float32) / rot_dim))
    t = jnp.arange(N, dtype=jnp.float32)
    freqs = jnp.repeat(t[:, None] * inv_freq[None, :], 2, axis=-1)   # (N, rot_dim)
    cos, sin = jnp.cos(freqs), jnp.sin(freqs)

    def rope(t):
        t_rot, t_pass = t[..., :rot_dim], t[..., rot_dim:]
        x1 = t_rot[..., 0::2]
        x2 = t_rot[..., 1::2]
        rotated = jnp.stack((-x2, x1), axis=-1).reshape(t_rot.shape)
        return jnp.concatenate([t_rot * cos + rotated * sin, t_pass], axis=-1)

    q, k = rope(q), rope(k)
    dots = jnp.einsum("bhqd,bhkd->bhqk", q, k) * scale
    dots = jnp.where(mask[:, None, :, :], 1e-9, dots)
    attn = jax.nn.softmax(dots, axis=-1)
    out = jnp.einsum("bhqk,bhkd->bhqd", attn, v)
    out = out.transpose(0, 2, 1, 3).reshape(B, N, H * Dh)
    return out @ w_out.T


if __name__ == "__main__":
    # Small shapes consistent with the module's forward.
    B, N, D = 2, 8, 64
    HEADS, DIM_HEAD = 4, 64
    HIDDEN = HEADS * DIM_HEAD

    key = jax.random.PRNGKey(0)
    kx, kq, ko, km = jax.random.split(key, 4)

    x = jax.random.normal(kx, (B, N, D), dtype=jnp.float32)
    # Deterministic parameter init (Linear weights, bias=False), torch (out, in) layout.
    w_qkv = jax.random.normal(kq, (3 * HIDDEN, D), dtype=jnp.float32) * (1.0 / math.sqrt(D))
    w_out = jax.random.normal(ko, (D, HIDDEN), dtype=jnp.float32) * (1.0 / math.sqrt(HIDDEN))
    mask = jax.random.bernoulli(km, 0.25, (B, N, N))

    out = attention_forward(x, mask, w_qkv, w_out, heads=HEADS, dim_head=DIM_HEAD)
    out = jax.block_until_ready(out)

    ref = attention_reference(x, mask, w_qkv, w_out, heads=HEADS, dim_head=DIM_HEAD)
    # Tolerance reflects bf16 matmul operands (f32 accumulation) vs a full-f32 reference.
    np.testing.assert_allclose(np.asarray(out), np.asarray(ref), rtol=2e-2, atol=3e-2)

    print("KERNEL_OK")
</pallas_src>

<mosaic_0001>
module attributes {stable_mosaic.version = 11 : i64} {
  func.func @_attention_kernel(%arg0: i32, %arg1: memref<1x8x64xf32, #tpu.memory_space<vmem>>, %arg2: memref<64x1280xbf16, #tpu.memory_space<vmem>>, %arg3: memref<256x64xbf16, #tpu.memory_space<vmem>>, %arg4: memref<8x64xf32, #tpu.memory_space<vmem>>, %arg5: memref<8x64xf32, #tpu.memory_space<vmem>>, %arg6: memref<1x8x8xi8, #tpu.memory_space<vmem>>, %arg7: memref<1x8x64xf32, #tpu.memory_space<vmem>>, %arg8: memref<8x256xf32, #tpu.memory_space<vmem>>) attributes {dimension_semantics = [#tpu.dimension_semantics<parallel>], iteration_bounds = array<i64: 2>, scalar_prefetch = 0 : i64, scratch_operands = 1 : i64, tpu.core_type = #tpu.core_type<tc>, window_params = [{transform_indices = @transform_0, window_bounds = array<i64: 1, 8, 64>}, {pipeline_mode = #tpu.pipeline_mode<synchronous>, transform_indices = @transform_1, window_bounds = array<i64: 64, 1280>}, {pipeline_mode = #tpu.pipeline_mode<synchronous>, transform_indices = @transform_2, window_bounds = array<i64: 256, 64>}, {pipeline_mode = #tpu.pipeline_mode<synchronous>, transform_indices = @transform_3, window_bounds = array<i64: 8, 64>}, {pipeline_mode = #tpu.pipeline_mode<synchronous>, transform_indices = @transform_4, window_bounds = array<i64: 8, 64>}, {transform_indices = @transform_5, window_bounds = array<i64: 1, 8, 8>}, {transform_indices = @transform_6, window_bounds = array<i64: 1, 8, 64>}]} {
    %c0 = arith.constant 0 : index
    %c0_0 = arith.constant 0 : index
    %c0_1 = arith.constant 0 : index
    %0 = vector.load %arg1[%c0, %c0_0, %c0_1] : memref<1x8x64xf32, #tpu.memory_space<vmem>>, vector<1x8x64xf32>
    %1 = vector.shape_cast %0 : vector<1x8x64xf32> to vector<8x64xf32>
    %2 = arith.truncf %1 : vector<8x64xf32> to vector<8x64xbf16>
    %c0_2 = arith.constant 0 : index
    %c0_3 = arith.constant 0 : index
    %3 = vector.load %arg2[%c0_2, %c0_3] : memref<64x1280xbf16, #tpu.memory_space<vmem>>, vector<64x1280xbf16>
    %cst = arith.constant dense<0.000000e+00> : vector<8x1280xf32>
    %4 = tpu.matmul %2, %3, %cst {dimension_numbers = #tpu.dot_dimension_numbers<[1], [0], [0], [1], [0, 0, 1, 1], [], []>} : vector<8x64xbf16>, vector<64x1280xbf16>, vector<8x1280xf32> -> vector<8x1280xf32>
    %c0_4 = arith.constant 0 : index
    %c0_5 = arith.constant 0 : index
    %5 = vector.load %arg4[%c0_4, %c0_5] : memref<8x64xf32, #tpu.memory_space<vmem>>, vector<8x64xf32>
    %c0_6 = arith.constant 0 : index
    %c0_7 = arith.constant 0 : index
    %6 = vector.load %arg5[%c0_6, %c0_7] : memref<8x64xf32, #tpu.memory_space<vmem>>, vector<8x64xf32>
    %c0_8 = arith.constant 0 : index
    %c0_9 = arith.constant 0 : index
    %c0_10 = arith.constant 0 : index
    %7 = vector.load %arg6[%c0_8, %c0_9, %c0_10] : memref<1x8x8xi8, #tpu.memory_space<vmem>>, vector<1x8x8xi8>
    %8 = vector.shape_cast %7 : vector<1x8x8xi8> to vector<8x8xi8>
    %c0_i8 = arith.constant 0 : i8
    %9 = vector.broadcast %c0_i8 : i8 to vector<8x8xi8>
    %10 = arith.cmpi ne, %8, %9 : vector<8x8xi8>
    %11 = vector.extract_strided_slice %4 {offsets = [0, 0], sizes = [8, 64], strides = [1, 1]} : vector<8x1280xf32> to vector<8x64xf32>
    %12 = arith.mulf %11, %5 : vector<8x64xf32>
    %13 = vector.extract_strided_slice %4 {offsets = [0, 256], sizes = [8, 64], strides = [1, 1]} : vector<8x1280xf32> to vector<8x64xf32>
    %14 = arith.mulf %13, %6 : vector<8x64xf32>
    %15 = arith.addf %12, %14 : vector<8x64xf32>
    %16 = vector.extract_strided_slice %4 {offsets = [0, 512], sizes = [8, 64], strides = [1, 1]} : vector<8x1280xf32> to vector<8x64xf32>
    %17 = arith.mulf %16, %5 : vector<8x64xf32>
    %18 = vector.extract_strided_slice %4 {offsets = [0, 768], sizes = [8, 64], strides = [1, 1]} : vector<8x1280xf32> to vector<8x64xf32>
    %19 = arith.mulf %18, %6 : vector<8x64xf32>
    %20 = arith.addf %17, %19 : vector<8x64xf32>
    %21 = vector.extract_strided_slice %4 {offsets = [0, 1024], sizes = [8, 64], strides = [1, 1]} : vector<8x1280xf32> to vector<8x64xf32>
    %cst_11 = arith.constant dense<0.000000e+00> : vector<8x8xf32>
    %22 = tpu.matmul %15, %20, %cst_11 {dimension_numbers = #tpu.dot_dimension_numbers<[1], [1], [0], [0], [0, 0, 1, 0], [], []>} : vector<8x64xf32>, vector<8x64xf32>, vector<8x8xf32> -> vector<8x8xf32>
    %cst_12 = arith.constant 9.99999971E-10 : f32
    %23 = vector.broadcast %cst_12 : f32 to vector<8x8xf32>
    %24 = arith.select %10, %23, %22 : vector<8x8xi1>, vector<8x8xf32>
    %cst_13 = arith.constant dense<0xFF800000> : vector<8xf32>
    %25 = vector.multi_reduction <maximumf>, %24, %cst_13 [1] : vector<8x8xf32> to vector<8xf32>
    %26 = vector.shape_cast %25 : vector<8xf32> to vector<8x1xf32>
    %27 = vector.broadcast %26 : vector<8x1xf32> to vector<8x8xf32>
    %28 = arith.subf %24, %27 : vector<8x8xf32>
    %29 = math.exp %28 : vector<8x8xf32>
    %cst_14 = arith.constant dense<0.000000e+00> : vector<8xf32>
    %30 = vector.multi_reduction <add>, %29, %cst_14 [1] : vector<8x8xf32> to vector<8xf32>
    %31 = vector.shape_cast %30 : vector<8xf32> to vector<8x1xf32>
    %32 = arith.truncf %29 : vector<8x8xf32> to vector<8x8xbf16>
    %33 = arith.truncf %21 : vector<8x64xf32> to vector<8x64xbf16>
    %cst_15 = arith.constant dense<0.000000e+00> : vector<8x64xf32>
    %34 = tpu.matmul %32, %33, %cst_15 {dimension_numbers = #tpu.dot_dimension_numbers<[1], [0], [0], [1], [0, 0, 1, 1], [], []>} : vector<8x8xbf16>, vector<8x64xbf16>, vector<8x64xf32> -> vector<8x64xf32>
    %35 = tpu.reciprocal %31 : vector<8x1xf32> -> vector<8x1xf32>
    %36 = vector.broadcast %35 : vector<8x1xf32> to vector<8x64xf32>
    %37 = arith.mulf %34, %36 : vector<8x64xf32>
    %c0_16 = arith.constant 0 : index
    %c0_17 = arith.constant 0 : index
    %38 = vector.load %arg8[%c0_16, %c0_17] : memref<8x256xf32, #tpu.memory_space<vmem>>, vector<8x64xf32>
    tpu.vector_store %arg8[%c0_16, %c0_17], %37 {strides = array<i32>} : memref<8x256xf32, #tpu.memory_space<vmem>>, vector<8x64xf32>,
    %39 = vector.extract_strided_slice %4 {offsets = [0, 64], sizes = [8, 64], strides = [1, 1]} : vector<8x1280xf32> to vector<8x64xf32>
    %40 = arith.mulf %39, %5 : vector<8x64xf32>
    %41 = vector.extract_strided_slice %4 {offsets = [0, 320], sizes = [8, 64], strides = [1, 1]} : vector<8x1280xf32> to vector<8x64xf32>
    %42 = arith.mulf %41, %6 : vector<8x64xf32>
    %43 = arith.addf %40, %42 : vector<8x64xf32>
    %44 = vector.extract_strided_slice %4 {offsets = [0, 576], sizes = [8, 64], strides = [1, 1]} : vector<8x1280xf32> to vector<8x64xf32>
    %45 = arith.mulf %44, %5 : vector<8x64xf32>
    %46 = vector.extract_strided_slice %4 {offsets = [0, 832], sizes = [8, 64], strides = [1, 1]} : vector<8x1280xf32> to vector<8x64xf32>
    %47 = arith.mulf %46, %6 : vector<8x64xf32>
    %48 = arith.addf %45, %47 : vector<8x64xf32>
    %49 = vector.extract_strided_slice %4 {offsets = [0, 1088], sizes = [8, 64], strides = [1, 1]} : vector<8x1280xf32> to vector<8x64xf32>
    %cst_18 = arith.constant dense<0.000000e+00> : vector<8x8xf32>
    %50 = tpu.matmul %43, %48, %cst_18 {dimension_numbers = #tpu.dot_dimension_numbers<[1], [1], [0], [0], [0, 0, 1, 0], [], []>} : vector<8x64xf32>, vector<8x64xf32>, vector<8x8xf32> -> vector<8x8xf32>
    %cst_19 = arith.constant 9.99999971E-10 : f32
    %51 = vector.broadcast %cst_19 : f32 to vector<8x8xf32>
    %52 = arith.select %10, %51, %50 : vector<8x8xi1>, vector<8x8xf32>
    %cst_20 = arith.constant dense<0xFF800000> : vector<8xf32>
    %53 = vector.multi_reduction <maximumf>, %52, %cst_20 [1] : vector<8x8xf32> to vector<8xf32>
    %54 = vector.shape_cast %53 : vector<8xf32> to vector<8x1xf32>
    %55 = vector.broadcast %54 : vector<8x1xf32> to vector<8x8xf32>
    %56 = arith.subf %52, %55 : vector<8x8xf32>
    %57 = math.exp %56 : vector<8x8xf32>
    %cst_21 = arith.constant dense<0.000000e+00> : vector<8xf32>
    %58 = vector.multi_reduction <add>, %57, %cst_21 [1] : vector<8x8xf32> to vector<8xf32>
    %59 = vector.shape_cast %58 : vector<8xf32> to vector<8x1xf32>
    %60 = arith.truncf %57 : vector<8x8xf32> to vector<8x8xbf16>
    %61 = arith.truncf %49 : vector<8x64xf32> to vector<8x64xbf16>
    %cst_22 = arith.constant dense<0.000000e+00> : vector<8x64xf32>
    %62 = tpu.matmul %60, %61, %cst_22 {dimension_numbers = #tpu.dot_dimension_numbers<[1], [0], [0], [1], [0, 0, 1, 1], [], []>} : vector<8x8xbf16>, vector<8x64xbf16>, vector<8x64xf32> -> vector<8x64xf32>
    %63 = tpu.reciprocal %59 : vector<8x1xf32> -> vector<8x1xf32>
    %64 = vector.broadcast %63 : vector<8x1xf32> to vector<8x64xf32>
    %65 = arith.mulf %62, %64 : vector<8x64xf32>
    %c0_23 = arith.constant 0 : index
    %c64 = arith.constant 64 : index
    %66 = vector.load %arg8[%c0_23, %c64] : memref<8x256xf32, #tpu.memory_space<vmem>>, vector<8x64xf32>
    tpu.vector_store %arg8[%c0_23, %c64], %65 {strides = array<i32>} : memref<8x256xf32, #tpu.memory_space<vmem>>, vector<8x64xf32>,
    %67 = vector.extract_strided_slice %4 {offsets = [0, 128], sizes = [8, 64], strides = [1, 1]} : vector<8x1280xf32> to vector<8x64xf32>
    %68 = arith.mulf %67, %5 : vector<8x64xf32>
    %69 = vector.extract_strided_slice %4 {offsets = [0, 384], sizes = [8, 64], strides = [1, 1]} : vector<8x1280xf32> to vector<8x64xf32>
    %70 = arith.mulf %69, %6 : vector<8x64xf32>
    %71 = arith.addf %68, %70 : vector<8x64xf32>
    %72 = vector.extract_strided_slice %4 {offsets = [0, 640], sizes = [8, 64], strides = [1, 1]} : vector<8x1280xf32> to vector<8x64xf32>
    %73 = arith.mulf %72, %5 : vector<8x64xf32>
    %74 = vector.extract_strided_slice %4 {offsets = [0, 896], sizes = [8, 64], strides = [1, 1]} : vector<8x1280xf32> to vector<8x64xf32>
    %75 = arith.mulf %74, %6 : vector<8x64xf32>
    %76 = arith.addf %73, %75 : vector<8x64xf32>
    %77 = vector.extract_strided_slice %4 {offsets = [0, 1152], sizes = [8, 64], strides = [1, 1]} : vector<8x1280xf32> to vector<8x64xf32>
    %cst_24 = arith.constant dense<0.000000e+00> : vector<8x8xf32>
    %78 = tpu.matmul %71, %76, %cst_24 {dimension_numbers = #tpu.dot_dimension_numbers<[1], [1], [0], [0], [0, 0, 1, 0], [], []>} : vector<8x64xf32>, vector<8x64xf32>, vector<8x8xf32> -> vector<8x8xf32>
    %cst_25 = arith.constant 9.99999971E-10 : f32
    %79 = vector.broadcast %cst_25 : f32 to vector<8x8xf32>
    %80 = arith.select %10, %79, %78 : vector<8x8xi1>, vector<8x8xf32>
    %cst_26 = arith.constant dense<0xFF800000> : vector<8xf32>
    %81 = vector.multi_reduction <maximumf>, %80, %cst_26 [1] : vector<8x8xf32> to vector<8xf32>
    %82 = vector.shape_cast %81 : vector<8xf32> to vector<8x1xf32>
    %83 = vector.broadcast %82 : vector<8x1xf32> to vector<8x8xf32>
    %84 = arith.subf %80, %83 : vector<8x8xf32>
    %85 = math.exp %84 : vector<8x8xf32>
    %cst_27 = arith.constant dense<0.000000e+00> : vector<8xf32>
    %86 = vector.multi_reduction <add>, %85, %cst_27 [1] : vector<8x8xf32> to vector<8xf32>
    %87 = vector.shape_cast %86 : vector<8xf32> to vector<8x1xf32>
    %88 = arith.truncf %85 : vector<8x8xf32> to vector<8x8xbf16>
    %89 = arith.truncf %77 : vector<8x64xf32> to vector<8x64xbf16>
    %cst_28 = arith.constant dense<0.000000e+00> : vector<8x64xf32>
    %90 = tpu.matmul %88, %89, %cst_28 {dimension_numbers = #tpu.dot_dimension_numbers<[1], [0], [0], [1], [0, 0, 1, 1], [], []>} : vector<8x8xbf16>, vector<8x64xbf16>, vector<8x64xf32> -> vector<8x64xf32>
    %91 = tpu.reciprocal %87 : vector<8x1xf32> -> vector<8x1xf32>
    %92 = vector.broadcast %91 : vector<8x1xf32> to vector<8x64xf32>
    %93 = arith.mulf %90, %92 : vector<8x64xf32>
    %c0_29 = arith.constant 0 : index
    %c128 = arith.constant 128 : index
    %94 = vector.load %arg8[%c0_29, %c128] : memref<8x256xf32, #tpu.memory_space<vmem>>, vector<8x64xf32>
    tpu.vector_store %arg8[%c0_29, %c128], %93 {strides = array<i32>} : memref<8x256xf32, #tpu.memory_space<vmem>>, vector<8x64xf32>,
    %95 = vector.extract_strided_slice %4 {offsets = [0, 192], sizes = [8, 64], strides = [1, 1]} : vector<8x1280xf32> to vector<8x64xf32>
    %96 = arith.mulf %95, %5 : vector<8x64xf32>
    %97 = vector.extract_strided_slice %4 {offsets = [0, 448], sizes = [8, 64], strides = [1, 1]} : vector<8x1280xf32> to vector<8x64xf32>
    %98 = arith.mulf %97, %6 : vector<8x64xf32>
    %99 = arith.addf %96, %98 : vector<8x64xf32>
    %100 = vector.extract_strided_slice %4 {offsets = [0, 704], sizes = [8, 64], strides = [1, 1]} : vector<8x1280xf32> to vector<8x64xf32>
    %101 = arith.mulf %100, %5 : vector<8x64xf32>
    %102 = vector.extract_strided_slice %4 {offsets = [0, 960], sizes = [8, 64], strides = [1, 1]} : vector<8x1280xf32> to vector<8x64xf32>
    %103 = arith.mulf %102, %6 : vector<8x64xf32>
    %104 = arith.addf %101, %103 : vector<8x64xf32>
    %105 = vector.extract_strided_slice %4 {offsets = [0, 1216], sizes = [8, 64], strides = [1, 1]} : vector<8x1280xf32> to vector<8x64xf32>
    %cst_30 = arith.constant dense<0.000000e+00> : vector<8x8xf32>
    %106 = tpu.matmul %99, %104, %cst_30 {dimension_numbers = #tpu.dot_dimension_numbers<[1], [1], [0], [0], [0, 0, 1, 0], [], []>} : vector<8x64xf32>, vector<8x64xf32>, vector<8x8xf32> -> vector<8x8xf32>
    %cst_31 = arith.constant 9.99999971E-10 : f32
    %107 = vector.broadcast %cst_31 : f32 to vector<8x8xf32>
    %108 = arith.select %10, %107, %106 : vector<8x8xi1>, vector<8x8xf32>
    %cst_32 = arith.constant dense<0xFF800000> : vector<8xf32>
    %109 = vector.multi_reduction <maximumf>, %108, %cst_32 [1] : vector<8x8xf32> to vector<8xf32>
    %110 = vector.shape_cast %109 : vector<8xf32> to vector<8x1xf32>
    %111 = vector.broadcast %110 : vector<8x1xf32> to vector<8x8xf32>
    %112 = arith.subf %108, %111 : vector<8x8xf32>
    %113 = math.exp %112 : vector<8x8xf32>
    %cst_33 = arith.constant dense<0.000000e+00> : vector<8xf32>
    %114 = vector.multi_reduction <add>, %113, %cst_33 [1] : vector<8x8xf32> to vector<8xf32>
    %115 = vector.shape_cast %114 : vector<8xf32> to vector<8x1xf32>
    %116 = arith.truncf %113 : vector<8x8xf32> to vector<8x8xbf16>
    %117 = arith.truncf %105 : vector<8x64xf32> to vector<8x64xbf16>
    %cst_34 = arith.constant dense<0.000000e+00> : vector<8x64xf32>
    %118 = tpu.matmul %116, %117, %cst_34 {dimension_numbers = #tpu.dot_dimension_numbers<[1], [0], [0], [1], [0, 0, 1, 1], [], []>} : vector<8x8xbf16>, vector<8x64xbf16>, vector<8x64xf32> -> vector<8x64xf32>
    %119 = tpu.reciprocal %115 : vector<8x1xf32> -> vector<8x1xf32>
    %120 = vector.broadcast %119 : vector<8x1xf32> to vector<8x64xf32>
    %121 = arith.mulf %118, %120 : vector<8x64xf32>
    %c0_35 = arith.constant 0 : index
    %c192 = arith.constant 192 : index
    %122 = vector.load %arg8[%c0_35, %c192] : memref<8x256xf32, #tpu.memory_space<vmem>>, vector<8x64xf32>
    tpu.vector_store %arg8[%c0_35, %c192], %121 {strides = array<i32>} : memref<8x256xf32, #tpu.memory_space<vmem>>, vector<8x64xf32>,
    %c0_36 = arith.constant 0 : index
    %c0_37 = arith.constant 0 : index
    %123 = vector.load %arg8[%c0_36, %c0_37] : memref<8x256xf32, #tpu.memory_space<vmem>>, vector<8x256xf32>
    %124 = arith.truncf %123 : vector<8x256xf32> to vector<8x256xbf16>
    %c0_38 = arith.constant 0 : index
    %c0_39 = arith.constant 0 : index
    %125 = vector.load %arg3[%c0_38, %c0_39] : memref<256x64xbf16, #tpu.memory_space<vmem>>, vector<256x64xbf16>
    %cst_40 = arith.constant dense<0.000000e+00> : vector<8x64xf32>
    %126 = tpu.matmul %124, %125, %cst_40 {dimension_numbers = #tpu.dot_dimension_numbers<[1], [0], [0], [1], [0, 0, 1, 1], [], []>} : vector<8x256xbf16>, vector<256x64xbf16>, vector<8x64xf32> -> vector<8x64xf32>
    %127 = vector.shape_cast %126 : vector<8x64xf32> to vector<1x8x64xf32>
    %c0_41 = arith.constant 0 : index
    %c0_42 = arith.constant 0 : index
    %c0_43 = arith.constant 0 : index
    %128 = vector.load %arg7[%c0_41, %c0_42, %c0_43] : memref<1x8x64xf32, #tpu.memory_space<vmem>>, vector<1x8x64xf32>
    tpu.vector_store %arg7[%c0_41, %c0_42, %c0_43], %127 {strides = array<i32>} : memref<1x8x64xf32, #tpu.memory_space<vmem>>, vector<1x8x64xf32>,
    return
  }
  func.func @transform_0(%arg0: i32) -> (i32, i32, i32) {
    %c0_i32 = arith.constant 0 : i32
    %c0_i32_0 = arith.constant 0 : i32
    %c0_i32_1 = arith.constant 0 : i32
    return %arg0, %c0_i32, %c0_i32_0 : i32, i32, i32
  }
  func.func @transform_1(%arg0: i32) -> (i32, i32) {
    %c0_i32 = arith.constant 0 : i32
    %c0_i32_0 = arith.constant 0 : i32
    %c0_i32_1 = arith.constant 0 : i32
    return %c0_i32, %c0_i32_0 : i32, i32
  }
  func.func @transform_2(%arg0: i32) -> (i32, i32) {
    %c0_i32 = arith.constant 0 : i32
    %c0_i32_0 = arith.constant 0 : i32
    %c0_i32_1 = arith.constant 0 : i32
    return %c0_i32, %c0_i32_0 : i32, i32
  }
  func.func @transform_3(%arg0: i32) -> (i32, i32) {
    %c0_i32 = arith.constant 0 : i32
    %c0_i32_0 = arith.constant 0 : i32
    %c0_i32_1 = arith.constant 0 : i32
    return %c0_i32, %c0_i32_0 : i32, i32
  }
  func.func @transform_4(%arg0: i32) -> (i32, i32) {
    %c0_i32 = arith.constant 0 : i32
    %c0_i32_0 = arith.constant 0 : i32
    %c0_i32_1 = arith.constant 0 : i32
    return %c0_i32, %c0_i32_0 : i32, i32
  }
  func.func @transform_5(%arg0: i32) -> (i32, i32, i32) {
    %c0_i32 = arith.constant 0 : i32
    %c0_i32_0 = arith.constant 0 : i32
    %c0_i32_1 = arith.constant 0 : i32
    return %arg0, %c0_i32, %c0_i32_0 : i32, i32, i32
  }
  func.func @transform_6(%arg0: i32) -> (i32, i32, i32) {
    %c0_i32 = arith.constant 0 : i32
    %c0_i32_0 = arith.constant 0 : i32
    %c0_i32_1 = arith.constant 0 : i32
    return %arg0, %c0_i32, %c0_i32_0 : i32, i32, i32
  }
}

</mosaic_0001>

<bundles_post_ra>
// kernel: tpu_custom_call.1
= control target key start
LH: loop header
LB: loop body
LE: loop exit
PB: predicated region body
PF: predicated region fallthrough
CT: control target
= control target key end

     0   :  { %11 = vsyncpa [#allocation4], 0  ;;  %s2380_s0 = inlined_call_operand.vmem [shape: f32[2,8,64], index: 0, kind: input, shape index: {}]   ;;  %s2381_s1 = inlined_call_operand.hbm [shape: bf16[64,1280], index: 1, kind: input, shape index: {}]   ;;  %s2382_s2 = inlined_call_operand.vmem [shape: bf16[256,64], index: 2, kind: input, shape index: {}]   ;;  %s2383_s3 = inlined_call_operand.vmem [shape: f32[8,64], index: 3, kind: input, shape index: {}]   ;;  %s2384_s4 = inlined_call_operand.vmem [shape: f32[8,64], index: 4, kind: input, shape index: {}]   ;;  %s2385_s5 = inlined_call_operand.vmem [shape: s8[2,8,8], index: 5, kind: input, shape index: {}]   ;;  %s2386_s6 = inlined_call_operand.hbm [shape: f32[2,8,64], index: 6, kind: output, shape index: {}]  }
   0x1   :  { %12 = vsyncpa [#allocation5], 0 }
   0x2   :  { %14 = vsyncpa [#allocation5 + $0x1], 0  ;;  %s2068_s21 = smov 0   ;;  %s2070_s22 = smov 0  }
   0x3   :  { %s2072_s23 = smov 0   ;;  %s2074_s24 = smov 0  }
   0x4 LB: > { %s2089_s25 = sadd.s32 4294967295, %s2023_s24   ;;  %s1613_s26 = sadd.s32 4294967294, %s2023_s24   ;;  %s2023_s24 = sphi %s2074_s24, %s2404_s24   ;;  %s2019_s23 = sphi %s2072_s23, %s2403_s23   ;;  %s2015_s22 = sphi %s2070_s22, %s2402_s22   ;;  %s2011_s21 = sphi %s2068_s21, %s2401_s21  }
   0x5   : > { %s2093_s27 = sadd.s32 1, %s2023_s24   ;;  %s163_s28 = sadd.s32 1, %s2019_s23 }
   0x6   : > { %s160_s29 = ssub.s32 %s2023_s24, %s2093_s27  ;;  %p173_p0 = scmp.ne.s32.totalorder %s2019_s23, %s2015_s22 }
   0x7   : > { %p161_p1 = scmp.eq.s32.totalorder %s160_s29, 0  ;;  %p174_p2 = scmp.eq.s32.totalorder %s2089_s25, 1 }
   0x8   : > { %p179_p3 = scmp.ne.s32.totalorder %s2015_s22, %s2011_s21  ;;  %p180_p4 = scmp.eq.s32.totalorder %s1613_s26, 1 }
   0x9   : > { %s2104_s30 = scalar_select %p161_p1, %s2019_s23, %s163_s28  }
   0xa   : > { %p2106_p5 = por %p174_p2, %p173_p0  ;;  %p2110_p6 = por %p180_p4, %p179_p3 }
   0xb   : > { %p1614_p7 = scmp.ge.s32.totalorder %s2023_s24, 1  ;;  %p187_p8 = scmp.lt.s32.totalorder %s2023_s24, 3 }
   0xc   : > { %s2390_s7 = scalar_select %p2106_p5, 1, 0 }
   0xd   : > { %s2391_s8 = scalar_select %p2110_p6, 1, 0 }
   0xe   : > { %p2387_p9 = scmp.eq.s32.totalorder %s2089_s25, 0  ;;  %p2117_p10 = pnand %p1614_p7, %p187_p8 }
   0xf   : > { %s2025_s10 = smov [#allocation3]   ;;  %s1929_s15 = scalar_lea.hbm %s2381_s1, 5120 }
  0x10   : > { %s2392_s9 = scalar_select %p2117_p10, 1, 0 }
  0x11   : > { %s199_s11 = sshll.u32 %s2025_s10, 4  ;;  %p1787_p11 = pneg %p2117_p10  ;;  %s200_s11 = int_to_ptr.vmem [resolvable:$true] %s199_s11 }
  0x12   : > { %p1930_p13 = scmp.ne.s32.totalorder %s2381_s1, %s1929_s15  ;;  %p1936_p3 = scmp.lt.u32.totalorder %s1929_s15, %s2381_s1 }
  0x13   : > { %p2125_p12 = pnand %p2387_p9, %p1787_p11 }
  0x15   : > { %p1931_p0 = pneg %p2125_p12 }
  0x17   : > { %p1932_p1 = pnand %p1931_p0, %p1930_p13 }
  0x19   : > { %p1933_p2 = pneg %p1932_p1 }
  0x1b   : > { %p1938_p4 = pnand %p1936_p3, %p1933_p2 }
  0x1d   : > { %1941 = shalt.err (!%p1938_p4)
}
  0x1e   : > { %s1942_s20 = scalar_lea.vmem %s200_s11, 5120  ;;  %p1950_p9 = scmp.lt.s32.totalorder %s200_s11, %s200_s11 }
  0x1f   : > { %p1943_p7 = scmp.ne.s32.totalorder %s200_s11, %s1942_s20  ;;  %p1951_p6 = scmp.lt.s32.totalorder %s1942_s20, %s1942_s20 }
  0x21   : > { %p1945_p8 = pnand %p1943_p7, %p1931_p0  ;;  %p1952_p5 = por %p1951_p6, %p1950_p9 }
  0x23   : > { %p1946_p11 = pneg %p1945_p8 }
  0x25   : > { %p1953_p10 = pnand %p1952_p5, %p1946_p11 }
  0x27   : > { %1956 = shalt.err (!%p1953_p10)
}
  0x28   : > { %s2026_s26 = smov 640   ;;  %s2027_s28 = smov 40  }
  0x29   : > { %1790 = dma.hbm_to_vmem [thread:$0]  (!%p2125_p12), %s2381_s1, 5120, %s200_s11, [#allocation4], %s2026_s26, %s2026_s26, %s2027_s28  }
  0x2a   : > { %p2394_p13 = scmp.ne.s32.totalorder %s2392_s9, 0 }
  0x2b   : > { %p2395_p1 = scmp.eq.s32.totalorder (!%p2394_p13), %s2089_s25, 0 }
  0x2c   : > { %238 = sbr.rel (%p2394_p13) target bundleno = 2025 (0x7e9), region = 44 }
  0x33   : > { %2002 = dma.done.wait (%p2395_p1), [#allocation4], 5120   ;;  %p2396_p0 = pmov %p2395_p1 }
  0x34   : > { %v2028_v0 = vmov 0   ;;  %p271_p5 = scmp.lt.s32.totalorder %s2089_s25, 1  ;;  %v1837_v1 = vld [vmem:[#allocation3 + $0x4] ss:$40 sps:$4 sm:$0xff]   ;;  %v1839_v2 = vld [vmem:[#allocation3] ss:$40 sps:$4 sm:$0xff]  }
  0x35   : > { %2004 = vsyncadd (%p2396_p0), [#allocation4], 4294962176  ;;  %560 = vmatprep.mubr.bf16.mxu0 %v2028_v0  ;;  %683 = vmatprep.mubr.bf16.mxu1 %v2028_v0  ;;  %v1840_v3 = vld [vmem:[#allocation3 + $0x54] ss:$40 sps:$4 sm:$0xff]   ;;  %v1842_v4 = vld [vmem:[#allocation3 + $0x50] ss:$40 sps:$4 sm:$0xff]  }
  0x36   : > { %s2155_s12 = scalar_select %p271_p5, %s2089_s25, 1  ;;  %528 = vmatprep.subr.bf16.mxu0 %v1837_v1  ;;  %v1843_v5 = vld [vmem:[#allocation3 + $0xa4] ss:$40 sps:$4 sm:$0xff]   ;;  %v1845_v6 = vld [vmem:[#allocation3 + $0xa0] ss:$40 sps:$4 sm:$0xff]   ;;  %vm524_vm0 = vcmask 523264  }
  0x37   : > { %529 = vmatpush1.bf16.msra.mxu0 %v1839_v2  ;;  %v1846_v7 = vld [vmem:[#allocation3 + $0xf4] ss:$40 sps:$4 sm:$0xff]   ;;  %v1848_v8 = vld [vmem:[#allocation3 + $0xf0] ss:$40 sps:$4 sm:$0xff]   ;;  %s2029_s17 = smov 64   ;;  %v2030_v37 = vmov 0.0  }
  0x38   : > { %530 = vmatprep.subr.bf16.mxu0 %v1840_v3  ;;  %s1620_s9 = sshll.u32 %s2155_s12, 3  ;;  %v1851_v10 = vld [vmem:[#allocation3 + $0xc] ss:$40 sps:$4 sm:$0xff]   ;;  %v1861_v11 = vld [vmem:[#allocation3 + $0x1c] ss:$40 sps:$4 sm:$0xff]   ;;  %vm2031_vm1 = vmmov 0  }
  0x39   : > { %s274_s14 = scalar_lea.vmem %s2380_s0, %s1620_s9  ;;  %v1863_v12 = vld [vmem:[#allocation3 + $0x18] ss:$40 sps:$4 sm:$0xff]   ;;  %651 = vmatprep.subr.bf16.mxu1 %v1861_v11  ;;  %v1867_v14 = vld [vmem:[#allocation3 + $0x6c] ss:$40 sps:$4 sm:$0xff]   ;;  %v1869_v15 = vld [vmem:[#allocation3 + $0x68] ss:$40 sps:$4 sm:$0xff]  }
  0x3a   : > { %v282_v9 = vld [vmem:[%s274_s14] sm:$0xff]  ;;  %652 = vmatpush1.bf16.msra.mxu1 %v1863_v12  ;;  %v1854_v17 = vld [vmem:[#allocation3 + $0x5c] ss:$40 sps:$4 sm:$0xff]   ;;  %v1852_v19 = vld [vmem:[#allocation3 + $0x58] ss:$40 sps:$4 sm:$0xff]   ;;  %vm838_vm2 = vcmask 1043456  }
  0x3b   : > { %531 = vmatpush1.bf16.msra.mxu0 %v1842_v4  ;;  %v2161_v13 = vpack.c.bf16 %v282_v9, %v282_v9  ;;  %v1849_v16 = vld [vmem:[#allocation3 + $0x8] ss:$40 sps:$4 sm:$0xff]   ;;  %653 = vmatprep.subr.bf16.mxu1 %v1867_v14  ;;  %v1873_v18 = vld [vmem:[#allocation3 + $0xbc] ss:$40 sps:$4 sm:$0xff]   ;;  %v1875_v20 = vld [vmem:[#allocation3 + $0xb8] ss:$40 sps:$4 sm:$0xff]  }
  0x3c   : > { %532 = vmatprep.subr.bf16.mxu0 %v1843_v5  ;;  %v1879_v21 = vld [vmem:[#allocation3 + $0x10c] ss:$40 sps:$4 sm:$0xff]   ;;  %v1855_v23 = vld [vmem:[#allocation3 + $0xa8] ss:$40 sps:$4 sm:$0xff]   ;;  %v1860_v26 = vld [vmem:[#allocation3 + $0xfc] ss:$40 sps:$4 sm:$0xff]  }
  0x3d   : > { %v1857_v22 = vld [vmem:[#allocation3 + $0xac] ss:$40 sps:$4 sm:$0xff]   ;;  %v1881_v24 = vld [vmem:[#allocation3 + $0x108] ss:$40 sps:$4 sm:$0xff]   ;;  %v1858_v28 = vld [vmem:[#allocation3 + $0xf8] ss:$40 sps:$4 sm:$0xff]  }
  0x3e   : > { %654 = vmatpush1.bf16.msra.mxu1 %v1869_v15  ;;  %v2169_v25 = vld [vmem:[%s2383_s3] sm:$0xff]  ;;  %v1872_v31 = vld [vmem:[#allocation3 + $0x64] ss:$40 sps:$4 sm:$0xff]   ;;  %v1870_v32 = vld [vmem:[#allocation3 + $0x60] ss:$40 sps:$4 sm:$0xff]   ;;  %s1621_s20 = sshll.u32 %s2155_s12, 1 }
  0x3f   : > { %533 = vmatpush1.bf16.msra.mxu0 %v1845_v6  ;;  %655 = vmatprep.subr.bf16.mxu1 %v1873_v18  ;;  %v2176_v27 = vld [vmem:[%s2384_s4] sm:$0xff]  ;;  %v1884_v35 = vld [vmem:[#allocation3 + $0x104] ss:$40 sps:$4 sm:$0xff]   ;;  %v1882_v36 = vld [vmem:[#allocation3 + $0x100] ss:$40 sps:$4 sm:$0xff]   ;;  %s278_s29 = scalar_lea.vmem %s2385_s5, %s1621_s20  ;;  %vm823_vm5 = vcmask 64512  }
  0x40   : > { %534 = vmatprep.subr.bf16.mxu0 %v1846_v7  ;;  %886 = vrot.lane.b32.xlu0 %v2169_v25, %s2029_s17  ;;  %v1866_v29 = vld [vmem:[#allocation3 + $0x14] ss:$40 sps:$4 sm:$0xff]   ;;  %v1864_v30 = vld [vmem:[#allocation3 + $0x10] ss:$40 sps:$4 sm:$0xff]   ;;  %v1885_v38 = vld [vmem:[#allocation3 + $0x20] ss:$40 sps:$4 sm:$0xff]  }
  0x41   : > { %v1878_v33 = vld [vmem:[#allocation3 + $0xb4] ss:$40 sps:$4 sm:$0xff]   ;;  %v1876_v34 = vld [vmem:[#allocation3 + $0xb0] ss:$40 sps:$4 sm:$0xff]   ;;  %v1887_v39 = vld [vmem:[#allocation3 + $0x24] ss:$40 sps:$4 sm:$0xff]  }
  0x42   : > { %656 = vmatpush1.bf16.msra.mxu1 %v1875_v20  ;;  %v1890_v40 = vld [vmem:[#allocation3 + $0x74] ss:$40 sps:$4 sm:$0xff]   ;;  %v1888_v41 = vld [vmem:[#allocation3 + $0x70] ss:$40 sps:$4 sm:$0xff]   ;;  %v1893_v42 = vld [vmem:[#allocation3 + $0xc4] ss:$40 sps:$4 sm:$0xff]  }
  0x43   : > { %535 = vmatpush1.bf16.msra.mxu0 %v1848_v8  ;;  %657 = vmatprep.subr.bf16.mxu1 %v1879_v21  ;;  %v1891_v43 = vld [vmem:[#allocation3 + $0xc0] ss:$40 sps:$4 sm:$0xff]   ;;  %v1896_v44 = vld [vmem:[#allocation3 + $0x114] ss:$40 sps:$4 sm:$0xff]   ;;  %v1894_v45 = vld [vmem:[#allocation3 + $0x110] ss:$40 sps:$4 sm:$0xff]  }
  0x44   : > { %569 = vmatprep.subr.bf16.mxu0 %v1851_v10  ;;  %891 = vrot.lane.b32.xlu0 %v2176_v27, %s2029_s17  ;;  %vm1045_vm6 = vcmask 1048064   ;;  %s268_s13 = sand.u32 1, %s2015_s22   ;;  %s1696_s15 = sshll.u32 %s2089_s25, 7 }
  0x45   : > { %s1619_s14 = sshll.u32 %s268_s13, 3  ;;  %s2337_s20 = scalar_lea.hbm %s2386_s6, %s1696_s15 }
  0x46   : > { %1662 = vmatmul.mubr.msk.bf16.vlgmr.msra.gmra.mrb[0].mxu0 %vm524_vm0, %v2161_v13  ;;  %658 = vmatpush1.bf16.msra.mxu1 %v1881_v24  ;;  %s270_s16 = scalar_lea.vmem [#allocation6], %s1619_s14  ;;  %s1517_s25 = scalar_lea.sflag [#allocation5], %s268_s13 }
  0x47   : > { %570 = vmatpush1.bf16.msra.mxu0 %v1849_v16  ;;  %601 = vmatprep.mubr.bf16.mxu0 %v2028_v0  ;;  %s1530_s18 = sshll.u32 %s270_s16, 4  ;;  %p2399_p9 = scmp.ne.s32.totalorder %s2390_s7, 0  ;;  %s2339_s18 = int_to_ptr.vmem [resolvable:$true] %s1530_s18 }
  0x48   : > { %571 = vmatprep.subr.bf16.mxu0 %v1854_v17  ;;  %1737 = vmatprep.subr.mxu1 %v2030_v37  ;;  %s1957_s26 = scalar_lea.vmem %s2339_s18, 128  ;;  %s2032_s28 = smov [#allocation6]  }
  0x49   : > { %1665 = vmatmul.mubr.msk.bf16.vlgmr.msra.gmra.mrb[0].mxu1 %vm524_vm0, %v2161_v13  ;;  %p1958_p6 = scmp.ne.s32.totalorder %s2339_s18, %s1957_s26 }
  0x4a   : > { %1739 = vmatprep.mubr.msk.f32.mxu1 %vm2031_vm1, %v2030_v37 }
  0x4b   : > { %572 = vmatpush1.bf16.msra.mxu0 %v1852_v19  ;;  %p1959_p10 = pnand %p1958_p6, %p2399_p9 }
  0x4c   : > { %573 = vmatprep.subr.bf16.mxu0 %v1857_v22 }
  0x4d   : > { %p1960_p12 = pneg %p1959_p10 }
  0x4f   : > { %574 = vmatpush1.bf16.msra.mxu0 %v1855_v23 }
  0x50   : > { %575 = vmatprep.subr.bf16.mxu0 %v1860_v26 }
  0x53   : > { %576 = vmatpush1.bf16.msra.mxu0 %v1858_v28  ;;  %v735_v28 = vld [vmem:[%s278_s29] sm:$0x3]  ;;  %s1961_s29 = sshll.u32 %s2032_s28, 4  ;;  %s1962_s29 = int_to_ptr.vmem [resolvable:$false] %s1961_s29 }
  0x54   : > { %610 = vmatprep.subr.bf16.mxu0 %v1866_v29  ;;  %vm736_vm3 = vnez %v735_v28  ;;  %s1963_s10 = scalar_lea.vmem %s1962_s29, 256  ;;  %p1964_p2 = scmp.lt.s32.totalorder %s2339_s18, %s1962_s29 }
  0x55   : > { %v819_v29 = vsel %vm736_vm3, 16843009, %v2028_v0  ;;  %p1965_p3 = scmp.lt.s32.totalorder %s1963_s10, %s1957_s26 }
  0x56   : > { %1663 = vmatmul.mubr.msk.bf16.vlgmr.msra.gmra.mrb[4].mxu0 %vm524_vm0, %v2161_v13 }
  0x57   : > { %611 = vmatpush1.bf16.msra.mxu0 %v1864_v30  ;;  %642 = vmatprep.mubr.bf16.mxu0 %v2028_v0  ;;  %v820_v30 = vunpack.c.0.s8 %v819_v29  ;;  %p1966_p4 = por %p1965_p3, %p1964_p2 }
  0x58   : > { %612 = vmatprep.subr.bf16.mxu0 %v1872_v31 }
  0x59   : > { %vm2219_vm4 = vcmp.ne.s32.totalorder %v820_v30, 0  ;;  %p1967_p7 = pnand %p1966_p4, %p1960_p12 }
  0x5b   : > { %613 = vmatpush1.bf16.msra.mxu0 %v1870_v32 }
  0x5c   : > { %614 = vmatprep.subr.bf16.mxu0 %v1878_v33 }
  0x5f   : > { %615 = vmatpush1.bf16.msra.mxu0 %v1876_v34 }
  0x60   : > { %616 = vmatprep.subr.bf16.mxu0 %v1884_v35 }
  0x63   : > { %617 = vmatpush1.bf16.msra.mxu0 %v1882_v36 }
  0x64   : > { %692 = vmatprep.subr.bf16.mxu0 %v1887_v39 }
  0x66   : > { %1664 = vmatmul.mubr.msk.bf16.vlgmr.msra.gmra.mrb[8].mxu0 %vm524_vm0, %v2161_v13 }
  0x67   : > { %724 = vmatprep.mubr.bf16.mxu0 %v2028_v0  ;;  %693 = vmatpush1.bf16.msra.mxu0 %v1885_v38 }
  0x68   : > { %694 = vmatprep.subr.bf16.mxu0 %v1890_v40 }
  0x6b   : > { %695 = vmatpush1.bf16.msra.mxu0 %v1888_v41 }
  0x6c   : > { %696 = vmatprep.subr.bf16.mxu0 %v1893_v42 }
  0x6f   : > { %697 = vmatpush1.bf16.msra.mxu0 %v1891_v43 }
  0x70   : > { %698 = vmatprep.subr.bf16.mxu0 %v1896_v44 }
  0x73   : > { %699 = vmatpush1.bf16.msra.mxu0 %v1894_v45 }
  0x74   : > { %1753 = vmatprep.subr.bf16.mxu0 %v2030_v37 }
  0x76   : > { %1666 = vmatmul.mubr.msk.bf16.vlgmr.msra.gmra.mrb[12].mxu0 %vm524_vm0, %v2161_v13 }
  0x77   : > { %1755 = vmatprep.mubr.msk.bf16.mxu0 %vm2031_vm1, %v2030_v37 }
  0xb2   : > { %v887_v50 = vpop.permute.xlu0 %886 }
  0xb6   : > { %v892_v54 = vpop.permute.xlu0 %891 }
 0x119   : > { %v562_v46 = vpop.f32.mrb[0].mxu0 }
 0x11a   : > { %v564_v47 = vpop.f32.mrb[1].mxu0  ;;  %v737_v57 = vmul.f32 %v2169_v25, %v562_v46  ;;  %v889_v59 = vmul.f32 %v887_v50, %v562_v46 }
 0x11b   : > { %v566_v48 = vpop.f32.mrb[2].mxu0  ;;  %v1047_v62 = vmul.f32 %v2169_v25, %v564_v47  ;;  %v1190_v63 = vmul.f32 %v887_v50, %v564_v47 }
 0x11c   : > { %v567_v49 = vpop.f32.mrb[3].mxu0  ;;  %v685_v51 = vpop.f32.mrb[0].mxu1 }
 0x11d   : > { %v687_v52 = vpop.f32.mrb[1].mxu1  ;;  %v741_v9 = vmul.f32 %v2176_v27, %v685_v51  ;;  %v897_v10 = vmul.f32 %v892_v54, %v685_v51 }
 0x11e   : > { %v689_v53 = vpop.f32.mrb[2].mxu1  ;;  %v1051_v11 = vmul.f32 %v2176_v27, %v687_v52  ;;  %v1194_v12 = vmul.f32 %v892_v54, %v687_v52 }
 0x11f   : > { %v690_v55 = vpop.f32.mrb[3].mxu1 }
 0x129   : > { %v603_v56 = vpop.f32.mrb[4].mxu0 }
 0x12a   : > { %v738_v58 = vmul.f32 %v2176_v27, %v603_v56  ;;  %v894_v60 = vmul.f32 %v892_v54, %v603_v56  ;;  %v605_v61 = vpop.f32.mrb[5].mxu0 }
 0x12b   : > { %v1048_v1 = vmul.f32 %v2176_v27, %v605_v61  ;;  %v1191_v2 = vmul.f32 %v892_v54, %v605_v61  ;;  %v607_v3 = vpop.f32.mrb[6].mxu0 }
 0x12c   : > { %v739_v4 = vadd.f32 %v738_v58, %v737_v57  ;;  %v895_v5 = vadd.f32 %v894_v60, %v889_v59  ;;  %v608_v6 = vpop.f32.mrb[7].mxu0 }
 0x12d   : > { %v2200_v7 = vadd.f32 %v1048_v1, %v1047_v62  ;;  %v1192_v8 = vadd.f32 %v1191_v2, %v1190_v63 }
 0x12e   : > { %900 = vrot.lane.b32.xlu0 %v895_v5, %s2029_s17 }
 0x139   : > { %v644_v13 = vpop.f32.mrb[8].mxu0 }
 0x13a   : > { %v740_v14 = vmul.f32 %v2169_v25, %v644_v13  ;;  %v896_v15 = vmul.f32 %v887_v50, %v644_v13  ;;  %v646_v16 = vpop.f32.mrb[9].mxu0 }
 0x13b   : > { %v1050_v17 = vmul.f32 %v2169_v25, %v646_v16  ;;  %v1193_v18 = vmul.f32 %v887_v50, %v646_v16  ;;  %v648_v19 = vpop.f32.mrb[10].mxu0 }
 0x13c   : > { %v742_v20 = vadd.f32 %v741_v9, %v740_v14  ;;  %v898_v21 = vadd.f32 %v897_v10, %v896_v15  ;;  %v649_v22 = vpop.f32.mrb[11].mxu0 }
 0x13d   : > { %v1052_v23 = vadd.f32 %v1051_v11, %v1050_v17  ;;  %v1195_v24 = vadd.f32 %v1194_v12, %v1193_v18 }
 0x13e   : > { %1738 = vmatpush3.xpose.msk.msra.mxu1 %vm524_vm0, %v742_v20 }
 0x13f   : > { %1742 = vmatprep.subr.bf16.mxu1 %v2030_v37 }
 0x141   : > { %1740 = vmatmul.mubr.msk.f32.vlgmr.msra.gmra.mrb[4].mxu1 %vm524_vm0, %v739_v4 }
 0x142   : > { %1744 = vmatprep.mubr.msk.bf16.mxu1 %vm2031_vm1, %v2030_v37 }
 0x149   : > { %v726_v26 = vpop.f32.mrb[12].mxu0 }
 0x14a   : > { %v834_v25 = vpack.c.bf16 %v726_v26, %v726_v26  ;;  %v728_v36 = vpop.f32.mrb[13].mxu0 }
 0x14b   : > { %v730_v0 = vpop.f32.mrb[14].mxu0  ;;  %v1140_v48 = vpack.c.bf16 %v728_v36, %v728_v36  ;;  %v1898_v36 = vld [vmem:[%s2382_s2] sm:$0xff]  }
 0x14c   : > { %v840_v27 = vsel %vm838_vm2, %v834_v25, 0  ;;  %v731_v38 = vpop.f32.mrb[15].mxu0  ;;  %v1899_v0 = vld [vmem:[%s2382_s2 + $0x48] sm:$0xff]  }
 0x14d   : > { %1743 = vmatpush3.bf16.msra.mxu1 %v840_v27  ;;  %v1145_v49 = vsel %vm838_vm2, %v1140_v48, 0 }
 0x14e   : > { %1748 = vmatprep.subr.mxu1 %v2030_v37 }
 0x1a0   : > { %v901_v47 = vpop.permute.xlu0 %900 }
 0x214   : > { %v815_v32 = vpop.f32.mrb[4].mxu1 }
 0x215   : > { %v822_v33 = vsel %vm2219_vm4, 1e-09, %v815_v32  ;;  %v1741_v34 = vpop.f32.mrb[5].mxu1 }
 0x216   : > { %v824_v35 = vsel %vm823_vm5, %v822_v33, -inf }
 0x217   : > { %825 = vmax.xlane.f32.xlu1 %v824_v35  ;;  %v1897_v35 = vld [vmem:[%s2382_s2 + $0x40] sm:$0xff]  }
 0x228   : > { %903 = vrot.lane.b32.xlu1 %v898_v21, %s2029_s17 }
 0x22c   : > { %991 = vrot.lane.b32.xlu1 %v834_v25, %s2029_s17 }
 0x230   : > { %1200 = vrot.lane.b32.xlu1 %v1195_v24, %s2029_s17 }
 0x234   : > { %1197 = vrot.lane.b32.xlu1 %v1192_v8, %s2029_s17 }
 0x2a4   : > { %v826_v39 = vpop.xlane.xlu1 %825 }
 0x2a5   : > { %v827_v40 = vsub.f32 %v822_v33, %v826_v39  ;;  %v1900_v39 = vld [vmem:[%s2382_s2 + $0x8] sm:$0xff]  }
 0x2a7   : > { %v828_v41 = vmul.f32 1.442695, %v827_v40  ;;  %v1901_v40 = vld [vmem:[%s2382_s2 + $0x50] sm:$0xff]  }
 0x2a8   : > { %v904_v42 = vpop.permute.xlu1 %903 }
 0x2a9   : > { %1913 = vpow2.f32 %v828_v41 }
 0x2ac   : > { %v992_v43 = vpop.permute.xlu1 %991 }
 0x2ad   : > { %v997_v44 = vsel %vm838_vm2, %v992_v43, 0  ;;  %v1903_v43 = vld [vmem:[%s2382_s2 + $0x58] sm:$0xff]  }
 0x2ae   : > { %1754 = vmatpush3.bf16.msra.mxu0 %v997_v44 }
 0x2af   : > { %1770 = vmatprep.subr.mxu0 %v2030_v37 }
 0x2b0   : > { %v1201_v4 = vpop.permute.xlu1 %1200 }
 0x2b3   : > { %v2232_v45 = vpop.eup %1913 }
 0x2b4   : > { %v833_v46 = vpack.c.bf16 %v2232_v45, %v2232_v45  ;;  %v1198_v6 = vpop.permute.xlu1 %1197  ;;  %v830_v32 = vsel %vm823_vm5, %v2232_v45, 0.0 }
 0x2b6   : > { %1745 = vmatmul.mubr.msk.bf16.vlgmr.msra.gmra.mrb[8].mxu1 %vm823_vm5, %v833_v46  ;;  %v1904_v46 = vld [vmem:[%s2382_s2 + $0x18] sm:$0xff]  }
 0x2b7   : > { %1749 = vmatpush3.xpose.msk.msra.mxu1 %vm524_vm0, %v904_v42  ;;  %1750 = vmatprep.mubr.msk.f32.mxu1 %vm2031_vm1, %v2030_v37  ;;  %v1902_v42 = vld [vmem:[%s2382_s2 + $0x10] sm:$0xff]  }
 0x2b8   : > { %1759 = vmatprep.subr.mxu1 %v2030_v37 }
 0x2be   : > { %1751 = vmatmul.mubr.msk.f32.vlgmr.msra.gmra.mrb[6].mxu1 %vm524_vm0, %v901_v47  ;;  %v1905_v47 = vld [vmem:[%s2382_s2 + $0x60] sm:$0xff]  }
 0x2bf   : > { %1760 = vmatpush3.xpose.msk.msra.mxu1 %vm524_vm0, %v1052_v23  ;;  %1761 = vmatprep.mubr.msk.f32.mxu1 %vm2031_vm1, %v2030_v37 }
 0x2c0   : > { %1764 = vmatprep.subr.bf16.mxu1 %v2030_v37 }
 0x2c2   : > { %1762 = vmatmul.mubr.msk.f32.vlgmr.msra.gmra.mrb[12].mxu1 %vm524_vm0, %v2200_v7 }
 0x2c3   : > { %1765 = vmatpush3.bf16.msra.mxu1 %v1145_v49  ;;  %1766 = vmatprep.mubr.msk.bf16.mxu1 %vm2031_vm1, %v2030_v37 }
 0x2c4   : > { %1715 = vmatprep.subr.bf16.mxu1 %v1897_v35 }
 0x389   : > { %v2251_v50 = vpop.f32.mrb[8].mxu1 }
 0x38a   : > { %v1746_v51 = vpop.f32.mrb[9].mxu1 }
 0x38b   : > { %v879_v52 = vpop.f32.mrb[10].mxu1  ;;  %v1906_v51 = vld [vmem:[%s2382_s2 + $0x20] sm:$0xff]  }
 0x38c   : > { %v1747_v53 = vpop.f32.mrb[11].mxu1  ;;  %v1907_v52 = vld [vmem:[%s2382_s2 + $0x68] sm:$0xff]  }
 0x391   : > { %v975_v54 = vpop.f32.mrb[6].mxu1 }
 0x392   : > { %v979_v55 = vsel %vm2219_vm4, 1e-09, %v975_v54  ;;  %v1752_v56 = vpop.f32.mrb[7].mxu1 }
 0x393   : > { %v980_v57 = vsel %vm823_vm5, %v979_v55, -inf  ;;  %v1909_v56 = vld [vmem:[%s2382_s2 + $0x70] sm:$0xff]  }
 0x394   : > { %981 = vmax.xlane.f32.xlu0 %v980_v57  ;;  %v1910_v57 = vld [vmem:[%s2382_s2 + $0x30] sm:$0xff]  }
 0x395   : > { %v1125_v58 = vpop.f32.mrb[12].mxu1 }
 0x396   : > { %v1763_v59 = vpop.f32.mrb[13].mxu1  ;;  %v1129_v60 = vsel %vm2219_vm4, 1e-09, %v1125_v58  ;;  %v1912_v58 = vld [vmem:[%s2382_s2 + $0x38] sm:$0xff]  }
 0x397   : > { %v1130_v61 = vsel %vm823_vm5, %v1129_v60, -inf }
 0x3aa   : > { %1288 = vrot.lane.b32.xlu0 %v1140_v48, %s2029_s17 }
 0x3c9   : > { %1131 = vmax.xlane.f32.xlu0 %v1130_v61 }
 0x421   : > { %v982_v62 = vpop.xlane.xlu0 %981 }
 0x422   : > { %v983_v63 = vsub.f32 %v979_v55, %v982_v62  ;;  %v1908_v55 = vld [vmem:[%s2382_s2 + $0x28] sm:$0xff]  }
 0x424   : > { %v984_v1 = vmul.f32 1.442695, %v983_v63 }
 0x425   : > { %v1289_v5 = vpop.permute.xlu0 %1288 }
 0x426   : > { %1915 = vpow2.f32 %v984_v1  ;;  %v1294_v7 = vsel %vm838_vm2, %v1289_v5, 0 }
 0x430   : > { %v1916_v2 = vpop.eup %1915 }
 0x431   : > { %v989_v3 = vpack.c.bf16 %v1916_v2, %v1916_v2  ;;  %v986_v30 = vsel %vm823_vm5, %v1916_v2, 0.0 }
 0x433   : > { %1756 = vmatmul.mubr.msk.bf16.vlgmr.msra.gmra.mrb[16].mxu0 %vm823_vm5, %v989_v3 }
 0x434   : > { %1771 = vmatpush3.xpose.msk.msra.mxu0 %vm524_vm0, %v1201_v4  ;;  %1772 = vmatprep.mubr.msk.f32.mxu0 %vm2031_vm1, %v2030_v37 }
 0x435   : > { %1775 = vmatprep.subr.bf16.mxu0 %v2030_v37 }
 0x43b   : > { %1773 = vmatmul.mubr.msk.f32.vlgmr.msra.gmra.mrb[20].mxu0 %vm524_vm0, %v1198_v6 }
 0x43c   : > { %1776 = vmatpush3.bf16.msra.mxu0 %v1294_v7  ;;  %1777 = vmatprep.mubr.msk.bf16.mxu0 %vm2031_vm1, %v2030_v37 }
 0x456   : > { %v1132_v8 = vpop.xlane.xlu0 %1131 }
 0x457   : > { %v1133_v9 = vsub.f32 %v1129_v60, %v1132_v8 }
 0x459   : > { %v1134_v10 = vmul.f32 1.442695, %v1133_v9 }
 0x45b   : > { %1917 = vpow2.f32 %v1134_v10 }
 0x465   : > { %v1918_v11 = vpop.eup %1917 }
 0x466   : > { %v1139_v12 = vpack.c.bf16 %v1918_v11, %v1918_v11  ;;  %v1136_v31 = vsel %vm823_vm5, %v1918_v11, 0.0 }
 0x468   : > { %1767 = vmatmul.mubr.msk.bf16.vlgmr.msra.gmra.mrb[16].mxu1 %vm823_vm5, %v1139_v12 }
 0x469   : > { %1716 = vmatpush3.bf16.msra.mxu1 %v1898_v36 }
 0x46a   : > { %1717 = vmatprep.subr.bf16.mxu1 %v1899_v0 }
 0x46d   : > { %1718 = vmatpush3.bf16.msra.mxu1 %v1900_v39 }
 0x46e   : > { %1719 = vmatprep.subr.bf16.mxu1 %v1901_v40 }
 0x471   : > { %1720 = vmatpush3.bf16.msra.mxu1 %v1902_v42 }
 0x472   : > { %1721 = vmatprep.subr.bf16.mxu1 %v1903_v43 }
 0x475   : > { %1722 = vmatpush3.bf16.msra.mxu1 %v1904_v46 }
 0x476   : > { %1723 = vmatprep.subr.bf16.mxu1 %v1905_v47 }
 0x479   : > { %1724 = vmatpush3.bf16.msra.mxu1 %v1906_v51 }
 0x47a   : > { %1725 = vmatprep.subr.bf16.mxu1 %v1907_v52 }
 0x47d   : > { %1726 = vmatpush3.bf16.msra.mxu1 %v1908_v55 }
 0x47e   : > { %1727 = vmatprep.subr.bf16.mxu1 %v1909_v56 }
 0x481   : > { %1728 = vmatpush3.bf16.msra.mxu1 %v1910_v57 }
 0x506   : > { %v1033_v13 = vpop.f32.mrb[16].mxu0 }
 0x507   : > { %v1757_v14 = vpop.f32.mrb[17].mxu0 }
 0x508   : > { %v1036_v15 = vpop.f32.mrb[18].mxu0 }
 0x509   : > { %v1758_v16 = vpop.f32.mrb[19].mxu0 }
 0x50e   : > { %v1272_v17 = vpop.f32.mrb[20].mxu0 }
 0x50f   : > { %v1276_v18 = vsel %vm2219_vm4, 1e-09, %v1272_v17  ;;  %v1774_v19 = vpop.f32.mrb[21].mxu0 }
 0x510   : > { %v1277_v20 = vsel %vm823_vm5, %v1276_v18, -inf }
 0x511   : > { %1278 = vmax.xlane.f32.xlu1 %v1277_v20 }
 0x53b   : > { %v1181_v37 = vpop.f32.mrb[16].mxu1 }
 0x53c   : > { %v1768_v21 = vpop.f32.mrb[17].mxu1 }
 0x53d   : > { %v1184_v22 = vpop.f32.mrb[18].mxu1 }
 0x53e   : > { %v1769_v23 = vpop.f32.mrb[19].mxu1 }
 0x59e   : > { %v1279_v24 = vpop.xlane.xlu1 %1278 }
 0x59f   : > { %v1280_v26 = vsub.f32 %v1276_v18, %v1279_v24 }
 0x5a1   : > { %v1281_v25 = vmul.f32 1.442695, %v1280_v26 }
 0x5a3   : > { %1919 = vpow2.f32 %v1281_v25 }
 0x5ad   : > { %v1920_v27 = vpop.eup %1919 }
 0x5ae   : > { %v1283_v28 = vsel %vm823_vm5, %v1920_v27, 0.0  ;;  %v1286_v29 = vpack.c.bf16 %v1920_v27, %v1920_v27 }
 0x5af   : > { %1284 = vadd.xlane.f32.xlu1 %v1283_v28 }
 0x5b0   : > { %1778 = vmatmul.mubr.msk.bf16.vlgmr.msra.gmra.mrb[24].mxu0 %vm823_vm5, %v1286_v29 }
 0x5b3   : > { %987 = vadd.xlane.f32.xlu1 %v986_v30 }
 0x5b7   : > { %1137 = vadd.xlane.f32.xlu1 %v1136_v31 }
 0x5bb   : > { %831 = vadd.xlane.f32.xlu1 %v830_v32 }
 0x63c   : > { %v1285_v33 = vpop.xlane.xlu1 %1284 }
 0x640   : > { %v988_v34 = vpop.xlane.xlu1 %987 }
 0x641   : > { %1921 = vrcp.f32 %v988_v34 }
 0x644   : > { %v1138_v38 = vpop.xlane.xlu1 %1137 }
 0x645   : > { %1923 = vrcp.f32 %v1138_v38 }
 0x648   : > { %v832_v41 = vpop.xlane.xlu1 %831 }
 0x649   : > { %1925 = vrcp.f32 %v832_v41 }
 0x64a   : > { %1927 = vrcp.f32 %v1285_v33 }
 0x64b   : > { %v1922_v44 = vpop.eup %1921 }
 0x64c   : > { %v1040_v45 = vmul.f32 %v1922_v44, %v1033_v13 }
 0x64e   : > { %1042 = vrot.lane.b32.xlu0 %v1040_v45, %s2029_s17 }
 0x64f   : > { %v1924_v48 = vpop.eup %1923 }
 0x650   : > { %v1188_v49 = vmul.f32 %v1924_v48, %v1181_v37 }
 0x652   : > { %1189 = vst.msk [vmem:[#allocation2 + $0x8] sm:$0xff] %vm524_vm0, %v1188_v49 }
 0x653   : > { %v1926_v53 = vpop.eup %1925 }
 0x654   : > { %v883_v54 = vmul.f32 %v1926_v53, %v2251_v50  ;;  %v1911_v50 = vld [vmem:[%s2382_s2 + $0x78] sm:$0xff]   ;;  %v1928_v59 = vpop.eup %1927 }
 0x655   : > { %1729 = vmatprep.subr.bf16.mxu1 %v1911_v50 }
 0x656   : > { %884 = vst.msk [vmem:[#allocation2] sm:$0xff] %vm524_vm0, %v883_v54  ;;  %1730 = vmatpush3.bf16.msra.mxu1 %v1912_v58 }
 0x683   : > { %v1330_v60 = vpop.f32.mrb[24].mxu0 }
 0x684   : > { %v1337_v61 = vmul.f32 %v1928_v59, %v1330_v60  ;;  %v1779_v62 = vpop.f32.mrb[25].mxu0 }
 0x685   : > { %v1333_v63 = vpop.f32.mrb[26].mxu0 }
 0x686   : > { %1339 = vrot.lane.b32.xlu1 %v1337_v61, %s2029_s17  ;;  %v1780_v1 = vpop.f32.mrb[27].mxu0 }
 0x6c0   : > { %v1043_v2 = vpop.permute.xlu0 %1042 }
 0x6c1   : > { %1046 = vst.msk [vmem:[#allocation2] sm:$0xff] %vm1045_vm6, %v1043_v2 }
 0x6c8   : > { %v1343_v4 = vld [vmem:[#allocation2] sm:$0xff] }
 0x6c9   : > { %v1345_v7 = vpack.c.bf16 %v1343_v4, %v1343_v4 }
 0x6f8   : > { %v1340_v3 = vpop.permute.xlu1 %1339 }
 0x6f9   : > { %1342 = vst.msk [vmem:[#allocation2 + $0x8] sm:$0xff] %vm1045_vm6, %v1340_v3 }
 0x700   : > { %v1344_v5 = vld [vmem:[#allocation2 + $0x8] sm:$0xff] }
 0x701   : > { %v1346_v6 = vpack.c.bf16 %v1344_v5, %v1344_v5 }
 0x703   : > { %1507 = vmatprep.mubr.bf16.mxu1 %v1346_v6 }
 0x704   : > { %1508 = vmatmul.mubr.bf16.vlgmr.msra.gmra.mrb[20].mxu1 %v1345_v7 }
 0x7d7   : > { %v1731_v8 = vpop.f32.mrb[20].mxu1 }
 0x7d8   : > { %v1732_v9 = vpop.f32.mrb[21].mxu1 }
 0x7d9   : > { %v1733_v10 = vadd.f32 %v1732_v9, %v1731_v8  ;;  %v1734_v11 = vpop.f32.mrb[22].mxu1 }
 0x7da   : > { %v1735_v12 = vpop.f32.mrb[23].mxu1 }
 0x7db   : > { %1515 = vst.msk [vmem:[%s270_s16] sm:$0xff] %vm524_vm0, %v1733_v10 }
 0x7dc   : > { %1970 = shalt.err (!%p1967_p7)
}
 0x7dd   : > { %s1971_s12 = scalar_lea.hbm %s2337_s20, 128  ;;  %s1975_s13 = scalar_lea.hbm %s2386_s6, 256 }
 0x7de   : > { %p1972_p8 = scmp.ne.s32.totalorder %s2337_s20, %s1971_s12  ;;  %p1976_p1 = scmp.lt.u32.totalorder %s2337_s20, %s2386_s6 }
 0x7df   : > { %p1977_p0 = scmp.lt.u32.totalorder %s1975_s13, %s1971_s12  ;;  %p1979_p6 = scmp.lt.u32.totalorder %s1971_s12, %s2337_s20 }
 0x7e0   : > { %p1973_p11 = pnand %p1972_p8, %p2399_p9 }
 0x7e1   : > { %p1978_p5 = por %p1977_p0, %p1976_p1 }
 0x7e2   : > { %p1974_p13 = pneg %p1973_p11 }
 0x7e3   : > { %p1980_p10 = por %p1979_p6, %p1978_p5 }
 0x7e5   : > { %p1981_p12 = pnand %p1980_p10, %p1974_p13 }
 0x7e7   : > { %1984 = shalt.err (!%p1981_p12)
}
 0x7e8   : > { %1785 = dma.vmem_to_hbm [thread:$0]  (%p2399_p9), %s2339_s18, 128, %s2337_s20, %s1517_s25  }
 0x7e9 PF: > { %p1797_p2 = scmp.ge.s32.totalorder %s2023_s24, 2  ;;  %s1542_s16 = sand.u32 1, %s2011_s21  }
 0x7ea   : > { %p2400_p3 = scmp.ne.s32.totalorder %s2391_s8, 0  ;;  %s1543_s17 = scalar_lea.sflag [#allocation5], %s1542_s16 }
 0x7ec   : > { %p1792_p4 = pnand %p1797_p2, %p2400_p3 }
 0x7ee   : > { %2006 = dma.done.wait (!%p1792_p4), %s1543_s17, 128  }
 0x7ef   : > { %2008 = vsyncadd (!%p1792_p4), %s1543_s17, 4294967168  ;;  %p17_p7 = scmp.ge.s32.totalorder %s2093_s27, 4   ;;  %s2401_s21 = smov %s2015_s22 }
 0x7f0   : > { %s2402_s22 = smov %s2019_s23  ;;  %s2403_s23 = smov %s2104_s30 }
 0x7f1   : > { %s2404_s24 = smov %s2093_s27  ;;  %19 = sbr.rel (!%p17_p7) target bundleno = 4 (0x4), region = 87 }
 0x7f8   :  { %1548 = vsyncpa [#allocation4], 1 }
 0x7f9   :  { %1550 = vsyncpa [#allocation4 + $0x1], 1 }
 0x7fa   :  { %1551 = vsyncpa [#allocation5], 1 }
 0x7fb   :  { %1553 = vsyncpa [#allocation5 + $0x1], 1 }

</bundles_post_ra>
